<compile_context>
chip_gen: v7x
topology: tpu7x:2x2x1
jax: 0.10.0
libtpu: 0.0.40
codegen_flags: <defaults>
</compile_context>

<pallas_src>
import functools

import jax
import jax.numpy as jnp
from jax.experimental import pallas as pl
from jax.experimental.pallas import tpu as pltpu


def _focal_loss_kernel(x_ref, t_ref, o_ref, *, gamma: float, batch: int,
                       tb: int):
    # x_ref/t_ref: (tb, C) tiles in VMEM; o_ref: (1, 1) resident accumulator.
    i = pl.program_id(0)

    @pl.when(i == 0)
    def _():
        o_ref[...] = jnp.zeros_like(o_ref)

    x = x_ref[...].astype(jnp.float32)
    t = t_ref[...].astype(jnp.float32)

    # Numerically stable log-softmax along the class (lane) axis.
    # exp() evaluated once; prob recovered via an exact divide.
    m = jnp.max(x, axis=-1, keepdims=True)
    z = x - m
    e = jnp.exp(z)
    s = jnp.sum(e, axis=-1, keepdims=True)
    log_prob = z - jnp.log(s)
    prob = e / s

    one_minus_p = 1.0 - prob
    if float(gamma).is_integer():
        focal = one_minus_p ** int(gamma)            # integer pow (VPU-only)
    else:
        focal = jnp.power(one_minus_p, jnp.float32(gamma))

    loss = -t * log_prob * focal                      # (tb, C)
    row_loss = jnp.sum(loss, axis=-1, keepdims=True)  # (tb, 1) lane reduce

    # Mask rows past the true batch (ragged tail tile reads padded garbage).
    row_ids = i * tb + jax.lax.broadcasted_iota(jnp.int32, (tb, 1), 0)
    row_loss = jnp.where(row_ids < batch, row_loss, 0.0)

    # Accumulate one scalar per tile into the resident output block.
    o_ref[...] += jnp.sum(row_loss, axis=0, keepdims=True)


def _pick_row_tile(batch: int, n_classes: int, itemsize: int) -> int:
    # 2 inputs x 2 pipeline buffers x tb x C x itemsize <= ~8 MiB
    # (fits v5e's 16 MiB default scoped VMEM; well under v6e/v7x limits).
    budget = 8 * 1024 * 1024
    tb = budget // (4 * n_classes * max(int(itemsize), 1))
    tb = max(8, (tb // 8) * 8)                 # sublane alignment
    padded_b = ((batch + 7) // 8) * 8
    return min(tb, padded_b)


def focal_loss(inputs: jax.Array, targets: jax.Array, gamma: float = 2.0,
               tb: int | None = None) -> jax.Array:
    """Equivalent of FocalLoss.forward: log_softmax over the last dim, focal
    weighting, sum over classes, mean over all leading dims."""
    assert inputs.shape == targets.shape
    n_classes = inputs.shape[-1]
    x2 = inputs.reshape(-1, n_classes)
    t2 = targets.reshape(-1, n_classes)
    batch = x2.shape[0]

    if tb is None:
        itemsize = max(jnp.dtype(x2.dtype).itemsize,
                       jnp.dtype(t2.dtype).itemsize)
        tb = _pick_row_tile(batch, n_classes, itemsize)
    assert tb % 8 == 0, "row tile must stay sublane-aligned"
    n_tiles = pl.cdiv(batch, tb)

    total = pl.pallas_call(
        functools.partial(_focal_loss_kernel, gamma=gamma, batch=batch, tb=tb),
        out_shape=jax.ShapeDtypeStruct((1, 1), jnp.float32),
        grid_spec=pltpu.PrefetchScalarGridSpec(
            num_scalar_prefetch=0,
            grid=(n_tiles,),
            in_specs=[
                pl.BlockSpec((tb, n_classes), lambda i: (i, 0)),
                pl.BlockSpec((tb, n_classes), lambda i: (i, 0)),
            ],
            # Same block for every grid step -> resident scalar accumulator.
            out_specs=pl.BlockSpec((1, 1), lambda i: (0, 0)),
        ),
        # Accumulator is carried across the grid axis -> "arbitrary".
        # (Per-tile-partial outputs + CORE_PARALLEL would shard across the two
        #  v7x TensorCores; kept serial here for portability/correctness.)
        compiler_params=pltpu.CompilerParams(
            dimension_semantics=("arbitrary",)),
    )(x2, t2)

    # loss.sum(dim=-1).mean() == total over all rows / true batch size
    return total[0, 0] / jnp.float32(batch)


def _focal_loss_ref(inputs, targets, gamma=2.0):
    log_prob = jax.nn.log_softmax(inputs.astype(jnp.float32), axis=-1)
    prob = jnp.exp(log_prob)
    loss = -targets.astype(jnp.float32) * log_prob * (1.0 - prob) ** gamma
    return jnp.mean(jnp.sum(loss, axis=-1))


if __name__ == "__main__":
    key = jax.random.PRNGKey(0)
    k1, k2, k3, k4 = jax.random.split(key, 4)

    # Case 1: lane-aligned, divisible batch, one-hot targets, auto tile.
    B, C = 16, 128
    x = jax.random.normal(k1, (B, C), dtype=jnp.float32)
    labels = jax.random.randint(k2, (B,), 0, C)
    t = jax.nn.one_hot(labels, C, dtype=jnp.float32)
    out = jax.block_until_ready(focal_loss(x, t, gamma=2.0))
    ref = _focal_loss_ref(x, t, gamma=2.0)
    assert jnp.allclose(out, ref, rtol=1e-5, atol=1e-5), (out, ref)

    # Case 2: ragged batch (B not a multiple of the tile) with soft targets —
    # exercises the cdiv grid + in-kernel tail-row masking path.
    B2, C2 = 20, 128
    x2 = jax.random.normal(k3, (B2, C2), dtype=jnp.float32)
    t2 = jax.nn.softmax(jax.random.normal(k4, (B2, C2), dtype=jnp.float32), -1)
    out2 = jax.block_until_ready(focal_loss(x2, t2, gamma=2.0, tb=8))
    ref2 = _focal_loss_ref(x2, t2, gamma=2.0)
    assert jnp.allclose(out2, ref2, rtol=1e-5, atol=1e-5), (out2, ref2)

    print("KERNEL_OK")
</pallas_src>

<mosaic_0001>
module attributes {stable_mosaic.version = 11 : i64} {
  func.func @_focal_loss_kernel(%arg0: i32, %arg1: memref<16x128xf32, #tpu.memory_space<vmem>>, %arg2: memref<16x128xf32, #tpu.memory_space<vmem>>, %arg3: memref<1x1xf32, #tpu.memory_space<vmem>>) attributes {dimension_semantics = [#tpu.dimension_semantics<arbitrary>], iteration_bounds = array<i64: 1>, scalar_prefetch = 0 : i64, scratch_operands = 0 : i64, tpu.core_type = #tpu.core_type<tc>, window_params = [{transform_indices = @transform_0, window_bounds = array<i64: 16, 128>}, {transform_indices = @transform_1, window_bounds = array<i64: 16, 128>}, {pipeline_mode = #tpu.pipeline_mode<synchronous>, transform_indices = @transform_2, window_bounds = array<i64: 1, 1>}]} {
    %c0_i32 = arith.constant 0 : i32
    %0 = arith.cmpi eq, %arg0, %c0_i32 : i32
    %1 = arith.extui %0 : i1 to i32
    %c0_i32_0 = arith.constant 0 : i32
    %2 = arith.cmpi ne, %1, %c0_i32_0 : i32
    scf.if %2 {
      %cst_15 = arith.constant 0.000000e+00 : f32
      %39 = vector.broadcast %cst_15 : f32 to vector<1x1xf32>
      %c0_16 = arith.constant 0 : index
      %c0_17 = arith.constant 0 : index
      %40 = vector.load %arg3[%c0_16, %c0_17] : memref<1x1xf32, #tpu.memory_space<vmem>>, vector<1x1xf32>
      tpu.vector_store %arg3[%c0_16, %c0_17], %39 {strides = array<i32>} : memref<1x1xf32, #tpu.memory_space<vmem>>, vector<1x1xf32>,
    } else {
    }
    %c0 = arith.constant 0 : index
    %c0_1 = arith.constant 0 : index
    %3 = vector.load %arg1[%c0, %c0_1] : memref<16x128xf32, #tpu.memory_space<vmem>>, vector<16x128xf32>
    %c0_2 = arith.constant 0 : index
    %c0_3 = arith.constant 0 : index
    %4 = vector.load %arg2[%c0_2, %c0_3] : memref<16x128xf32, #tpu.memory_space<vmem>>, vector<16x128xf32>
    %cst = arith.constant dense<0xFF800000> : vector<16xf32>
    %5 = vector.multi_reduction <maximumf>, %3, %cst [1] : vector<16x128xf32> to vector<16xf32>
    %6 = vector.shape_cast %5 : vector<16xf32> to vector<16x1xf32>
    %7 = vector.broadcast %6 : vector<16x1xf32> to vector<16x128xf32>
    %8 = arith.subf %3, %7 : vector<16x128xf32>
    %9 = math.exp %8 : vector<16x128xf32>
    %cst_4 = arith.constant dense<0.000000e+00> : vector<16xf32>
    %10 = vector.multi_reduction <add>, %9, %cst_4 [1] : vector<16x128xf32> to vector<16xf32>
    %11 = vector.shape_cast %10 : vector<16xf32> to vector<16x1xf32>
    %12 = math.log %11 : vector<16x1xf32>
    %13 = vector.broadcast %12 : vector<16x1xf32> to vector<16x128xf32>
    %14 = arith.subf %8, %13 : vector<16x128xf32>
    %15 = vector.broadcast %11 : vector<16x1xf32> to vector<16x128xf32>
    %16 = arith.divf %9, %15 : vector<16x128xf32>
    %cst_5 = arith.constant 1.000000e+00 : f32
    %17 = vector.broadcast %cst_5 : f32 to vector<16x128xf32>
    %18 = arith.subf %17, %16 : vector<16x128xf32>
    %19 = arith.mulf %18, %18 : vector<16x128xf32>
    %cst_6 = arith.constant 0.000000e+00 : f32
    %20 = vector.broadcast %cst_6 : f32 to vector<16x128xf32>
    %21 = arith.subf %20, %4 : vector<16x128xf32>
    %22 = arith.mulf %21, %14 : vector<16x128xf32>
    %23 = arith.mulf %22, %19 : vector<16x128xf32>
    %cst_7 = arith.constant dense<0.000000e+00> : vector<16xf32>
    %24 = vector.multi_reduction <add>, %23, %cst_7 [1] : vector<16x128xf32> to vector<16xf32>
    %25 = vector.shape_cast %24 : vector<16xf32> to vector<16x1xf32>
    %c16_i32 = arith.constant 16 : i32
    %26 = arith.muli %arg0, %c16_i32 : i32
    %27 = tpu.iota {dimensions = array<i32: 0>} : vector<16x1xi32>
    %28 = vector.broadcast %26 : i32 to vector<16x1xi32>
    %29 = arith.addi %28, %27 : vector<16x1xi32>
    %c16_i32_8 = arith.constant 16 : i32
    %30 = vector.broadcast %c16_i32_8 : i32 to vector<16x1xi32>
    %31 = arith.cmpi slt, %29, %30 : vector<16x1xi32>
    %cst_9 = arith.constant 0.000000e+00 : f32
    %32 = vector.broadcast %cst_9 : f32 to vector<16x1xf32>
    %33 = arith.select %31, %25, %32 : vector<16x1xi1>, vector<16x1xf32>
    %c0_10 = arith.constant 0 : index
    %c0_11 = arith.constant 0 : index
    %34 = vector.load %arg3[%c0_10, %c0_11] : memref<1x1xf32, #tpu.memory_space<vmem>>, vector<1x1xf32>
    %cst_12 = arith.constant dense<0.000000e+00> : vector<1xf32>
    %35 = vector.multi_reduction <add>, %33, %cst_12 [0] : vector<16x1xf32> to vector<1xf32>
    %36 = vector.shape_cast %35 : vector<1xf32> to vector<1x1xf32>
    %37 = arith.addf %34, %36 : vector<1x1xf32>
    %c0_13 = arith.constant 0 : index
    %c0_14 = arith.constant 0 : index
    %38 = vector.load %arg3[%c0_13, %c0_14] : memref<1x1xf32, #tpu.memory_space<vmem>>, vector<1x1xf32>
    tpu.vector_store %arg3[%c0_13, %c0_14], %37 {strides = array<i32>} : memref<1x1xf32, #tpu.memory_space<vmem>>, vector<1x1xf32>,
    return
  }
  func.func @transform_0(%arg0: i32) -> (i32, i32) {
    %c0_i32 = arith.constant 0 : i32
    %c0_i32_0 = arith.constant 0 : i32
    return %arg0, %c0_i32 : i32, i32
  }
  func.func @transform_1(%arg0: i32) -> (i32, i32) {
    %c0_i32 = arith.constant 0 : i32
    %c0_i32_0 = arith.constant 0 : i32
    return %arg0, %c0_i32 : i32, i32
  }
  func.func @transform_2(%arg0: i32) -> (i32, i32) {
    %c0_i32 = arith.constant 0 : i32
    %c0_i32_0 = arith.constant 0 : i32
    %c0_i32_1 = arith.constant 0 : i32
    return %c0_i32, %c0_i32_0 : i32, i32
  }
}

</mosaic_0001>

<bundles_post_ra>
// kernel: tpu_custom_call.1
= control target key start
LH: loop header
LB: loop body
LE: loop exit
PB: predicated region body
PF: predicated region fallthrough
CT: control target
= control target key end

     0   :  { %7 = vsyncpa [#allocation3], 0  ;;  %s275_s0 = inlined_call_operand.hbm [shape: f32[16,128], index: 0, kind: input, shape index: {}]   ;;  %s276_s1 = inlined_call_operand.hbm [shape: f32[16,128], index: 1, kind: input, shape index: {}]   ;;  %s277_s2 = inlined_call_operand.hbm [shape: f32[1,1], index: 2, kind: output, shape index: {}]  }
   0x1   :  { %8 = vsyncpa [#allocation6], 0 }
   0x2   :  { %9 = vsyncpa [#allocation4], 0  ;;  %s216_s9 = smov [#allocation2]   ;;  %s144_s13 = scalar_lea.hbm %s275_s0, 256 }
   0x3   :  { %s15_s10 = sshll.u32 %s216_s9, 4  ;;  %p145_p0 = scmp.ne.s32.totalorder %s275_s0, %s144_s13  ;;  %s16_s10 = int_to_ptr.vmem [resolvable:$true] %s15_s10 }
   0x4   :  { %p148_p1 = scmp.lt.u32.totalorder %s144_s13, %s275_s0 }
   0x6   :  { %p150_p2 = pnand %p148_p1, %p145_p0 }
   0x8   :  { %153 = shalt.err (!%p150_p2)
}
   0x9   :  { %s154_s18 = scalar_lea.vmem %s16_s10, 256  ;;  %p159_p4 = scmp.lt.s32.totalorder %s16_s10, %s16_s10 }
   0xa   :  { %p155_p3 = scmp.ne.s32.totalorder %s16_s10, %s154_s18  ;;  %p160_p5 = scmp.lt.s32.totalorder %s154_s18, %s154_s18 }
   0xc   :  { %p161_p6 = por %p160_p5, %p159_p4 }
   0xe   :  { %p162_p7 = pnand %p161_p6, %p155_p3 }
  0x10   :  { %165 = shalt.err (!%p162_p7)
}
  0x11   :  { %s217_s19 = smov 128   ;;  %s218_s20 = smov 8  }
  0x12   :  { %21 = dma.hbm_to_vmem [thread:$0]  %s275_s0, 256, %s16_s10, [#allocation3], %s217_s19, %s217_s19, %s218_s20  }
  0x13   :  { %s219_s23 = smov [#allocation5]   ;;  %s166_s27 = scalar_lea.hbm %s276_s1, 256 }
  0x14   :  { %s27_s24 = sshll.u32 %s219_s23, 4  ;;  %p167_p8 = scmp.ne.s32.totalorder %s276_s1, %s166_s27  ;;  %s28_s24 = int_to_ptr.vmem [resolvable:$true] %s27_s24 }
  0x15   :  { %p170_p9 = scmp.lt.u32.totalorder %s166_s27, %s276_s1 }
  0x17   :  { %p172_p10 = pnand %p170_p9, %p167_p8 }
  0x19   :  { %175 = shalt.err (!%p172_p10)
}
  0x1a   :  { %s176_s4 = scalar_lea.vmem %s28_s24, 256  ;;  %p181_p12 = scmp.lt.s32.totalorder %s28_s24, %s28_s24 }
  0x1b   :  { %p177_p11 = scmp.ne.s32.totalorder %s28_s24, %s176_s4  ;;  %p182_p13 = scmp.lt.s32.totalorder %s176_s4, %s176_s4 }
  0x1d   :  { %p183_p0 = por %p182_p13, %p181_p12 }
  0x1f   :  { %p184_p1 = pnand %p183_p0, %p177_p11 }
  0x21   :  { %187 = shalt.err (!%p184_p1)
}
  0x22   :  { %33 = dma.hbm_to_vmem [thread:$0]  %s276_s1, 256, %s28_s24, [#allocation6], %s217_s19, %s217_s19, %s218_s20  }
  0x23   :  { %210 = dma.done.wait [#allocation3], 256  }
  0x24   :  { %211 = vsyncadd [#allocation3], 4294967040 }
  0x25   :  { %212 = dma.done.wait [#allocation6], 256  }
  0x26   :  { %213 = vsyncadd [#allocation6], 4294967040  ;;  %v46_v0 = vld [vmem:[#allocation2] sm:$0xff]  ;;  %v47_v1 = vld [vmem:[#allocation2 + $0x8] sm:$0xff]  ;;  %vm44_vm0 = vcmask 0   ;;  %v220_v34 = vmov 0.0  }
  0x27   :  { %50 = vmax.xlane.f32.xlu0 %v46_v0  ;;  %v48_v12 = vld [vmem:[#allocation5] sm:$0xff]  ;;  %v49_v18 = vld [vmem:[#allocation5 + $0x8] sm:$0xff]  ;;  %45 = vst.msk [vmem:[#allocation7] sm:$0x1] %vm44_vm0, %v220_v34  ;;  %s221_s1 = smov [#allocation7]  }
  0x28   :  { %v78_v16 = vsub.f32 0.0, %v48_v12  ;;  %v79_v25 = vsub.f32 0.0, %v49_v18  ;;  %s116_s6 = sshll.u32 %s221_s1, 4  ;;  %s117_s6 = int_to_ptr.vmem [resolvable:$true] %s116_s6 }
  0x29   :  { %s188_s7 = scalar_lea.vmem %s117_s6, 16  ;;  %s192_s8 = scalar_lea.vmem %s117_s6, 32 }
  0x2a   :  { %p189_p2 = scmp.ne.s32.totalorder %s117_s6, %s188_s7  ;;  %p193_p3 = scmp.lt.s32.totalorder %s117_s6, %s117_s6 }
  0x2b   :  { %52 = vmax.xlane.f32.xlu0 %v47_v1  ;;  %p194_p4 = scmp.lt.s32.totalorder %s192_s8, %s188_s7 }
  0x2d   :  { %p195_p5 = por %p194_p4, %p193_p3 }
  0x2e   :  { %v99_v43 = vld [vmem:[#allocation7] sm:$0x1] }
  0x2f   :  { %p196_p6 = pnand %p195_p5, %p189_p2 }
  0xb4   :  { %v51_v2 = vpop.xlane.xlu0 %50 }
  0xb5   :  { %v54_v3 = vsub.f32 %v46_v0, %v51_v2 }
  0xb7   :  { %v56_v4 = vmul.f32 1.442695, %v54_v3 }
  0xb8   :  { %v53_v5 = vpop.xlane.xlu0 %52 }
  0xb9   :  { %132 = vpow2.f32 %v56_v4  ;;  %v55_v6 = vsub.f32 %v47_v1, %v53_v5 }
  0xbb   :  { %v58_v7 = vmul.f32 1.442695, %v55_v6 }
  0xbd   :  { %134 = vpow2.f32 %v58_v7 }
  0xc3   :  { %v133_v8 = vpop.eup %132 }
  0xc4   :  { %60 = vadd.xlane.f32.xlu1 %v133_v8 }
  0xc7   :  { %v135_v9 = vpop.eup %134 }
  0xc8   :  { %62 = vadd.xlane.f32.xlu1 %v135_v9 }
 0x151   :  { %v61_v10 = vpop.xlane.xlu1 %60 }
 0x152   :  { %136 = vlog2.f32 %v61_v10 }
 0x153   :  { %138 = vrcp.f32 %v61_v10 }
 0x155   :  { %v63_v11 = vpop.xlane.xlu1 %62 }
 0x156   :  { %140 = vlog2.f32 %v63_v11 }
 0x157   :  { %142 = vrcp.f32 %v63_v11 }
 0x15c   :  { %v137_v13 = vpop.eup %136 }
 0x15d   :  { %v139_v14 = vpop.eup %138  ;;  %v65_v15 = vmul.f32 0.6931472, %v137_v13 }
 0x15e   :  { %v71_v17 = vmul.f32 %v139_v14, %v133_v8 }
 0x15f   :  { %v68_v19 = vsub.f32 %v54_v3, %v65_v15 }
 0x160   :  { %v141_v20 = vpop.eup %140  ;;  %v74_v21 = vsub.f32 1.0, %v71_v17 }
 0x161   :  { %v143_v22 = vpop.eup %142  ;;  %v67_v23 = vmul.f32 0.6931472, %v141_v20  ;;  %v80_v24 = vmul.f32 %v78_v16, %v68_v19 }
 0x162   :  { %v76_v26 = vmul.f32 %v74_v21, %v74_v21  ;;  %v73_v27 = vmul.f32 %v143_v22, %v135_v9 }
 0x163   :  { %v69_v28 = vsub.f32 %v55_v6, %v67_v23 }
 0x164   :  { %v82_v29 = vmul.f32 %v80_v24, %v76_v26  ;;  %v75_v30 = vsub.f32 1.0, %v73_v27 }
 0x165   :  { %v81_v31 = vmul.f32 %v79_v25, %v69_v28 }
 0x166   :  { %84 = vadd.xlane.f32.xlu0 %v82_v29  ;;  %v77_v32 = vmul.f32 %v75_v30, %v75_v30 }
 0x168   :  { %v83_v33 = vmul.f32 %v81_v31, %v77_v32 }
 0x16a   :  { %86 = vadd.xlane.f32.xlu1 %v83_v33 }
 0x1f3   :  { %v85_v35 = vpop.xlane.xlu0 %84 }
 0x1f7   :  { %v87_v36 = vpop.xlane.xlu1 %86 }
 0x1f8   :  { %v100_v37 = vadd.f32 %v87_v36, %v85_v35 }
 0x1fa   :  { %v101_v38 = vrot.slane %v100_v37, 4 }
 0x1fc   :  { %v102_v39 = vadd.f32 %v101_v38, %v100_v37 }
 0x1fe   :  { %v103_v40 = vrot.slane %v102_v39, 2 }
 0x200   :  { %v104_v41 = vadd.f32 %v103_v40, %v102_v39 }
 0x202   :  { %v105_v42 = vrot.slane %v104_v41, 1 }
 0x204   :  { %v106_v44 = vadd.f32 %v105_v42, %v104_v41 }
 0x206   :  { %v107_v45 = vadd.f32 %v106_v44, %v99_v43 }
 0x208   :  { %109 = vst.msk [vmem:[#allocation7] sm:$0x1] %vm44_vm0, %v107_v45 }
 0x209   :  { %199 = shalt.err (!%p196_p6)
}
 0x20a   :  { %s200_s11 = scalar_lea.hbm %s277_s2, 16 }
 0x20b   :  { %p201_p7 = scmp.ne.s32.totalorder %s277_s2, %s200_s11  ;;  %p204_p8 = scmp.lt.u32.totalorder %s200_s11, %s277_s2 }
 0x20d   :  { %p206_p9 = pnand %p204_p8, %p201_p7 }
 0x20f   :  { %209 = shalt.err (!%p206_p9)
}
 0x210   :  { %119 = dma.vmem_to_hbm [thread:$0]  %s117_s6, 16, %s277_s2, [#allocation4]  }
 0x211   :  { %214 = dma.done.wait [#allocation4], 16  }
 0x212   :  { %215 = vsyncadd [#allocation4], 4294967280 }
 0x213   :  { %123 = vsyncpa [#allocation3], 1 }
 0x214   :  { %124 = vsyncpa [#allocation6], 1 }
 0x215   :  { %125 = vsyncpa [#allocation4], 1 }

</bundles_post_ra>
